<compile_context>
chip_gen: v5e
topology: v5e:2x2
jax: 0.10.0
libtpu: 0.0.40
codegen_flags: <defaults>
</compile_context>

<pallas_src>
import numpy as np
import jax
import jax.numpy as jnp
from jax import lax
from jax.experimental import pallas as pl
from jax.experimental.pallas import tpu as pltpu

_N_THRESH = 101
_LANES = 128          # thresholds padded to a full lane; samples per row
_R_INNER = 8          # rows (of 128 samples) per inner-loop chunk = one f32 vreg
_MAX_TILE_R = 2048    # rows per grid step -> 1 MiB/input block, ~4 MiB double-buffered
_PAD_LOGIT = -1e30    # sigmoid(pad) == 0.0 exactly -> never counted anywhere


def _pfbeta_kernel(thr_ref, x_ref, l_ref, out_ref, acc_ct, acc_l, acc_pl, acc_p):
    step = pl.program_id(0)

    @pl.when(step == 0)
    def _init():
        acc_ct[...] = jnp.zeros_like(acc_ct)
        acc_l[...] = jnp.zeros_like(acc_l)
        acc_pl[...] = jnp.zeros_like(acc_pl)
        acc_p[...] = jnp.zeros_like(acc_p)

    n_chunks = x_ref.shape[0] // _R_INNER            # static
    thr = thr_ref[...]                               # hoisted: (128,128), read once
    ones_row = jnp.ones((1, _LANES), jnp.bfloat16)   # hoisted constant

    def chunk_body(k, carry):
        r0 = pl.multiple_of(k * _R_INNER, _R_INNER)
        xs = x_ref[pl.ds(r0, _R_INNER), :]           # (8, 128) logits
        ls = l_ref[pl.ds(r0, _R_INNER), :]           # (8, 128) labels (0/1)
        p = 1.0 / (1.0 + jnp.exp(-xs))               # fused sigmoid (EUP), in [0, 1]

        # Continuous (non-binarized) pfbeta partials -> VMEM scratch (no carries;
        # ls / xs die right after, keeping vreg pressure low).
        acc_l[...] += ls
        acc_pl[...] += p * ls
        acc_p[...] += p

        lb = ls.astype(jnp.bfloat16)                 # exact 0/1 in bf16
        ct = jnp.zeros((2, _LANES), jnp.float32)
        for r in range(_R_INNER):                    # static unroll over the 8 rows
            p_r = p[r:r + 1, :]                      # (1, 128) samples, lane-dense
            # mask[t, s] = (sigmoid(x_s) > thr_t): f32 compare (exact strict '>'),
            # cast straight to 0/1 bf16 — no f32 select + repack.
            mask_r = (p_r > thr).astype(jnp.bfloat16)                   # (128, 128)
            lhs = jnp.concatenate([lb[r:r + 1, :], ones_row], axis=0)   # (2, 128)
            # MXU: row0 = ctp per threshold, row1 = #predicted-positive per threshold
            ct = ct + lax.dot_general(
                lhs, mask_r,
                dimension_numbers=(((1,), (1,)), ((), ())),
                preferred_element_type=jnp.float32)                     # (2, 128)
        acc_ct[...] += ct
        return carry

    lax.fori_loop(0, n_chunks, chunk_body, 0)

    # Finalize: one lane-dense, full-vreg store of all partial sums.
    @pl.when(step == pl.num_programs(0) - 1)
    def _finalize():
        out_ref[...] = jnp.concatenate(
            [acc_ct[...],                                             # rows 0-1
             jnp.sum(acc_l[...], axis=0, keepdims=True),              # row 2
             jnp.sum(acc_pl[...], axis=0, keepdims=True),             # row 3
             jnp.sum(acc_p[...], axis=0, keepdims=True),              # row 4
             jnp.zeros((3, _LANES), jnp.float32)],                    # pad rows
            axis=0)


def _pfbeta_counts(logits_2d, labels_2d, thr_mat, tile_r):
    r_pad = logits_2d.shape[0]
    n_steps = r_pad // tile_r
    return pl.pallas_call(
        _pfbeta_kernel,
        out_shape=jax.ShapeDtypeStruct((8, _LANES), jnp.float32),
        grid_spec=pltpu.PrefetchScalarGridSpec(
            num_scalar_prefetch=0,
            grid=(n_steps,),
            in_specs=[
                pl.BlockSpec((_LANES, _LANES), lambda i: (0, 0)),     # thresholds
                pl.BlockSpec((tile_r, _LANES), lambda i: (i, 0)),     # logits
                pl.BlockSpec((tile_r, _LANES), lambda i: (i, 0)),     # labels
            ],
            out_specs=pl.BlockSpec((8, _LANES), lambda i: (0, 0)),
            scratch_shapes=[
                pltpu.VMEM((2, _LANES), jnp.float32),         # ctp / n_pred per thr
                pltpu.VMEM((_R_INNER, _LANES), jnp.float32),  # sum(label)
                pltpu.VMEM((_R_INNER, _LANES), jnp.float32),  # sum(p * label)
                pltpu.VMEM((_R_INNER, _LANES), jnp.float32),  # sum(p)
            ],
        ),
        compiler_params=pltpu.CompilerParams(
            dimension_semantics=("arbitrary",),
        ),
        cost_estimate=pl.CostEstimate(
            flops=int(r_pad) * _LANES * (4 * _LANES + 8),
            transcendentals=int(r_pad) * _LANES,
            bytes_accessed=int(r_pad) * _LANES * 8 + _LANES * _LANES * 4,
        ),
    )(thr_mat, logits_2d, labels_2d)


class PfbetaPallas:
    """JAX / Pallas-TPU reimplementation of the PyTorch `Pfbeta` metric module."""

    def __init__(self, binarize=True, return_thres=False, average_both=False):
        self.return_thres = return_thres
        self.bin = binarize
        self.avg_both = average_both

    @staticmethod
    def _pfbeta_from_sums(ctp, cfp, y_true, beta=1.0):
        bsq = beta * beta
        denom = ctp + cfp
        prec = jnp.where(denom > 0.0, ctp / jnp.where(denom > 0.0, denom, 1.0), 0.0)
        rec = jnp.where(y_true > 0.0, ctp / jnp.where(y_true > 0.0, y_true, 1.0), 0.0)
        valid = (prec > 0.0) & (rec > 0.0)
        return jnp.where(
            valid,
            (1.0 + bsq) * prec * rec / jnp.where(valid, bsq * prec + rec, 1.0),
            0.0,
        )

    def __call__(self, approx, target):
        logits = approx.astype(jnp.float32).reshape(-1)   # sigmoid is fused in-kernel
        lbl = target.astype(jnp.float32).reshape(-1)

        # Data-dependent label binarization via 98th percentile; the full-sort
        # percentile only runs when labels are not already {0,1}.
        is_bin = jnp.all((lbl == 0.0) | (lbl == 1.0))
        lbl = lax.cond(
            is_bin,
            lambda l: l,
            lambda l: (l >= jnp.percentile(l, 98.0)).astype(jnp.float32),
            lbl,
        )

        n = logits.shape[0]
        n_rows = max(1, pl.cdiv(n, _LANES))
        tile_r = min(_MAX_TILE_R,
                     ((n_rows + _R_INNER - 1) // _R_INNER) * _R_INNER)
        n_steps = max(1, pl.cdiv(n_rows, tile_r))
        r_pad = n_steps * tile_r
        n_pad = r_pad * _LANES

        # Lane-dense sample slabs; padding never contributes (sigmoid(pad)=0, label=0).
        x2d = jnp.pad(logits, (0, n_pad - n),
                      constant_values=_PAD_LOGIT).reshape(r_pad, _LANES)
        l2d = jnp.pad(lbl, (0, n_pad - n)).reshape(r_pad, _LANES)

        thres = jnp.linspace(0.0, 1.0, _N_THRESH).astype(jnp.float32)
        thr_col = jnp.full((_LANES,), 2.0, jnp.float32).at[:_N_THRESH].set(thres)
        thr_mat = jnp.tile(thr_col[:, None], (1, _LANES))   # (128 thr, 128 lanes)

        sums = _pfbeta_counts(x2d, l2d, thr_mat, tile_r)

        ctp = sums[0, :_N_THRESH]                 # binarized true-positive count / thr
        tot = sums[1, :_N_THRESH]                 # predicted-positive count / thr
        y_true = jnp.sum(sums[2, :])              # total positive labels
        ctp_c = jnp.sum(sums[3, :])               # continuous sum(p * label)
        cfp_c = jnp.sum(sums[4, :]) - ctp_c       # continuous sum(p * (1 - label))

        f1s = self._pfbeta_from_sums(ctp, tot - ctp, y_true)   # binarized pF1 per thr
        best_idx = jnp.argmax(f1s)
        best_f1 = f1s[best_idx]
        best_thr = thres[best_idx]
        cont_f1 = self._pfbeta_from_sums(ctp_c, cfp_c, y_true)

        if self.avg_both:
            return (best_f1 + cont_f1) / 2.0
        elif self.bin:
            if self.return_thres:
                return (best_f1, best_thr)
            return best_f1
        else:
            return cont_f1


# ---------------- pure numpy reference (mirrors the torch code) ----------------
def _ref_pfbeta(labels, predictions, beta=1.0):
    labels = np.asarray(labels).reshape(-1)
    predictions = np.asarray(predictions).reshape(-1)
    if not np.isin(labels, [0.0, 1.0]).all():
        labels = (labels >= np.percentile(labels, 98)).astype(float)
    y_true_count = 0
    ctp = 0.0
    cfp = 0.0
    for idx in range(len(labels)):
        prediction = min(max(predictions[idx], 0), 1)
        if labels[idx]:
            y_true_count += 1
            ctp += prediction
        else:
            cfp += prediction
    bsq = beta * beta
    if ctp + cfp == 0:
        return 0.0
    p = ctp / (ctp + cfp)
    r = ctp / y_true_count
    if p > 0 and r > 0:
        return (1 + bsq) * p * r / (bsq * p + r)
    return 0.0


def _ref_forward_default(approx_sigmoid, target):
    thres = np.linspace(0, 1, 101)
    f1s = [_ref_pfbeta(target, approx_sigmoid > thr) for thr in thres]
    return f1s[int(np.argmax(f1s))]


if __name__ == "__main__":
    key = jax.random.PRNGKey(0)
    k1, k2 = jax.random.split(key)
    # Probabilities at bin centres (0.005, 0.015, ..., 0.995): comfortably away from
    # every decision threshold, so tiny sigmoid-rounding differences cannot flip a
    # strict '>' compare between the kernel and the float64 numpy reference.
    bins = jax.random.randint(k1, (8, 32), 0, 100)
    probs = (bins.astype(jnp.float32) + 0.5) / 100.0
    approx = jnp.log(probs / (1.0 - probs))                               # logits
    target = (jax.random.uniform(k2, (8, 32)) < 0.3).astype(jnp.float32)  # binary labels

    metric = PfbetaPallas()                    # default: binarize=True
    score = jax.block_until_ready(metric(approx, target))

    metric_cont = PfbetaPallas(binarize=False)
    score_cont = jax.block_until_ready(metric_cont(approx, target))

    # reference (float64 numpy, mirrors torch forward)
    approx_np = np.asarray(approx, dtype=np.float64)
    sig_np = 1.0 / (1.0 + np.exp(-approx_np))
    target_np = np.asarray(target, dtype=np.float64)
    ref_bin = _ref_forward_default(sig_np, target_np)
    ref_cont = _ref_pfbeta(target_np, sig_np)

    assert np.allclose(float(score), ref_bin, atol=1e-5), (float(score), ref_bin)
    assert np.allclose(float(score_cont), ref_cont, atol=1e-4), (float(score_cont), ref_cont)

    print("KERNEL_OK")
</pallas_src>

<mosaic_0001>
module attributes {stable_mosaic.version = 11 : i64} {
  func.func @_pfbeta_kernel(%arg0: i32, %arg1: memref<128x128xf32, #tpu.memory_space<vmem>>, %arg2: memref<8x128xf32, #tpu.memory_space<vmem>>, %arg3: memref<8x128xf32, #tpu.memory_space<vmem>>, %arg4: memref<8x128xf32, #tpu.memory_space<vmem>>, %arg5: memref<2x128xf32, #tpu.memory_space<vmem>>, %arg6: memref<8x128xf32, #tpu.memory_space<vmem>>, %arg7: memref<8x128xf32, #tpu.memory_space<vmem>>, %arg8: memref<8x128xf32, #tpu.memory_space<vmem>>) attributes {dimension_semantics = [#tpu.dimension_semantics<arbitrary>], iteration_bounds = array<i64: 1>, scalar_prefetch = 0 : i64, scratch_operands = 4 : i64, tpu.core_type = #tpu.core_type<tc>, window_params = [{pipeline_mode = #tpu.pipeline_mode<synchronous>, transform_indices = @transform_0, window_bounds = array<i64: 128, 128>}, {transform_indices = @transform_1, window_bounds = array<i64: 8, 128>}, {transform_indices = @transform_2, window_bounds = array<i64: 8, 128>}, {pipeline_mode = #tpu.pipeline_mode<synchronous>, transform_indices = @transform_3, window_bounds = array<i64: 8, 128>}]} {
    %c0_i32 = arith.constant 0 : i32
    %0 = arith.cmpi eq, %arg0, %c0_i32 : i32
    %1 = arith.extui %0 : i1 to i32
    %c0_i32_0 = arith.constant 0 : i32
    %2 = arith.cmpi ne, %1, %c0_i32_0 : i32
    scf.if %2 {
      %cst_35 = arith.constant 0.000000e+00 : f32
      %116 = vector.broadcast %cst_35 : f32 to vector<2x128xf32>
      %c0_36 = arith.constant 0 : index
      %c0_37 = arith.constant 0 : index
      %117 = vector.load %arg5[%c0_36, %c0_37] : memref<2x128xf32, #tpu.memory_space<vmem>>, vector<2x128xf32>
      tpu.vector_store %arg5[%c0_36, %c0_37], %116 {strides = array<i32>} : memref<2x128xf32, #tpu.memory_space<vmem>>, vector<2x128xf32>,
      %cst_38 = arith.constant 0.000000e+00 : f32
      %118 = vector.broadcast %cst_38 : f32 to vector<8x128xf32>
      %c0_39 = arith.constant 0 : index
      %c0_40 = arith.constant 0 : index
      %119 = vector.load %arg6[%c0_39, %c0_40] : memref<8x128xf32, #tpu.memory_space<vmem>>, vector<8x128xf32>
      tpu.vector_store %arg6[%c0_39, %c0_40], %118 {strides = array<i32>} : memref<8x128xf32, #tpu.memory_space<vmem>>, vector<8x128xf32>,
      %cst_41 = arith.constant 0.000000e+00 : f32
      %120 = vector.broadcast %cst_41 : f32 to vector<8x128xf32>
      %c0_42 = arith.constant 0 : index
      %c0_43 = arith.constant 0 : index
      %121 = vector.load %arg7[%c0_42, %c0_43] : memref<8x128xf32, #tpu.memory_space<vmem>>, vector<8x128xf32>
      tpu.vector_store %arg7[%c0_42, %c0_43], %120 {strides = array<i32>} : memref<8x128xf32, #tpu.memory_space<vmem>>, vector<8x128xf32>,
      %cst_44 = arith.constant 0.000000e+00 : f32
      %122 = vector.broadcast %cst_44 : f32 to vector<8x128xf32>
      %c0_45 = arith.constant 0 : index
      %c0_46 = arith.constant 0 : index
      %123 = vector.load %arg8[%c0_45, %c0_46] : memref<8x128xf32, #tpu.memory_space<vmem>>, vector<8x128xf32>
      tpu.vector_store %arg8[%c0_45, %c0_46], %122 {strides = array<i32>} : memref<8x128xf32, #tpu.memory_space<vmem>>, vector<8x128xf32>,
    } else {
    }
    %c0 = arith.constant 0 : index
    %c0_1 = arith.constant 0 : index
    %3 = vector.load %arg1[%c0, %c0_1] : memref<128x128xf32, #tpu.memory_space<vmem>>, vector<128x128xf32>
    %cst = arith.constant 1.000000e+00 : bf16
    %4 = vector.broadcast %cst : bf16 to vector<1x128xbf16>
    %c0_i32_2 = arith.constant 0 : i32
    %c8_i32 = arith.constant 8 : i32
    %5 = arith.muli %c0_i32_2, %c8_i32 : i32
    %6 = tpu.assume_multiple %5, 8 : i32
    %7 = arith.index_cast %6 : i32 to index
    %c0_3 = arith.constant 0 : index
    %8 = vector.load %arg2[%7, %c0_3] : memref<8x128xf32, #tpu.memory_space<vmem>>, vector<8x128xf32>
    %9 = arith.index_cast %6 : i32 to index
    %c0_4 = arith.constant 0 : index
    %10 = vector.load %arg3[%9, %c0_4] : memref<8x128xf32, #tpu.memory_space<vmem>>, vector<8x128xf32>
    %cst_5 = arith.constant 0.000000e+00 : f32
    %11 = vector.broadcast %cst_5 : f32 to vector<8x128xf32>
    %12 = arith.subf %11, %8 : vector<8x128xf32>
    %13 = math.exp %12 : vector<8x128xf32>
    %cst_6 = arith.constant 1.000000e+00 : f32
    %14 = vector.broadcast %cst_6 : f32 to vector<8x128xf32>
    %15 = arith.addf %14, %13 : vector<8x128xf32>
    %cst_7 = arith.constant 1.000000e+00 : f32
    %16 = vector.broadcast %cst_7 : f32 to vector<8x128xf32>
    %17 = arith.divf %16, %15 : vector<8x128xf32>
    %c0_8 = arith.constant 0 : index
    %c0_9 = arith.constant 0 : index
    %18 = vector.load %arg6[%c0_8, %c0_9] : memref<8x128xf32, #tpu.memory_space<vmem>>, vector<8x128xf32>
    %19 = arith.addf %18, %10 : vector<8x128xf32>
    %c0_10 = arith.constant 0 : index
    %c0_11 = arith.constant 0 : index
    %20 = vector.load %arg6[%c0_10, %c0_11] : memref<8x128xf32, #tpu.memory_space<vmem>>, vector<8x128xf32>
    tpu.vector_store %arg6[%c0_10, %c0_11], %19 {strides = array<i32>} : memref<8x128xf32, #tpu.memory_space<vmem>>, vector<8x128xf32>,
    %c0_12 = arith.constant 0 : index
    %c0_13 = arith.constant 0 : index
    %21 = vector.load %arg7[%c0_12, %c0_13] : memref<8x128xf32, #tpu.memory_space<vmem>>, vector<8x128xf32>
    %22 = arith.mulf %17, %10 : vector<8x128xf32>
    %23 = arith.addf %21, %22 : vector<8x128xf32>
    %c0_14 = arith.constant 0 : index
    %c0_15 = arith.constant 0 : index
    %24 = vector.load %arg7[%c0_14, %c0_15] : memref<8x128xf32, #tpu.memory_space<vmem>>, vector<8x128xf32>
    tpu.vector_store %arg7[%c0_14, %c0_15], %23 {strides = array<i32>} : memref<8x128xf32, #tpu.memory_space<vmem>>, vector<8x128xf32>,
    %c0_16 = arith.constant 0 : index
    %c0_17 = arith.constant 0 : index
    %25 = vector.load %arg8[%c0_16, %c0_17] : memref<8x128xf32, #tpu.memory_space<vmem>>, vector<8x128xf32>
    %26 = arith.addf %25, %17 : vector<8x128xf32>
    %c0_18 = arith.constant 0 : index
    %c0_19 = arith.constant 0 : index
    %27 = vector.load %arg8[%c0_18, %c0_19] : memref<8x128xf32, #tpu.memory_space<vmem>>, vector<8x128xf32>
    tpu.vector_store %arg8[%c0_18, %c0_19], %26 {strides = array<i32>} : memref<8x128xf32, #tpu.memory_space<vmem>>, vector<8x128xf32>,
    %28 = arith.truncf %10 : vector<8x128xf32> to vector<8x128xbf16>
    %cst_20 = arith.constant 0.000000e+00 : f32
    %29 = vector.broadcast %cst_20 : f32 to vector<2x128xf32>
    %30 = vector.extract_strided_slice %17 {offsets = [0, 0], sizes = [1, 128], strides = [1, 1]} : vector<8x128xf32> to vector<1x128xf32>
    %31 = vector.broadcast %30 : vector<1x128xf32> to vector<128x128xf32>
    %32 = arith.cmpf ogt, %31, %3 : vector<128x128xf32>
    %33 = arith.extui %32 : vector<128x128xi1> to vector<128x128xi32>
    %34 = arith.sitofp %33 : vector<128x128xi32> to vector<128x128xf32>
    %35 = arith.truncf %34 : vector<128x128xf32> to vector<128x128xbf16>
    %36 = vector.extract_strided_slice %28 {offsets = [0, 0], sizes = [1, 128], strides = [1, 1]} : vector<8x128xbf16> to vector<1x128xbf16>
    %37 = tpu.concatenate %36, %4 in 0 : vector<1x128xbf16>, vector<1x128xbf16> -> vector<2x128xbf16>
    %cst_21 = arith.constant dense<0.000000e+00> : vector<2x128xf32>
    %38 = tpu.matmul %37, %35, %cst_21 {dimension_numbers = #tpu.dot_dimension_numbers<[1], [1], [0], [0], [0, 0, 1, 0], [], []>} : vector<2x128xbf16>, vector<128x128xbf16>, vector<2x128xf32> -> vector<2x128xf32>
    %39 = arith.addf %29, %38 : vector<2x128xf32>
    %40 = vector.extract_strided_slice %17 {offsets = [1, 0], sizes = [1, 128], strides = [1, 1]} : vector<8x128xf32> to vector<1x128xf32>
    %41 = vector.broadcast %40 : vector<1x128xf32> to vector<128x128xf32>
    %42 = arith.cmpf ogt, %41, %3 : vector<128x128xf32>
    %43 = arith.extui %42 : vector<128x128xi1> to vector<128x128xi32>
    %44 = arith.sitofp %43 : vector<128x128xi32> to vector<128x128xf32>
    %45 = arith.truncf %44 : vector<128x128xf32> to vector<128x128xbf16>
    %46 = vector.extract_strided_slice %28 {offsets = [1, 0], sizes = [1, 128], strides = [1, 1]} : vector<8x128xbf16> to vector<1x128xbf16>
    %47 = tpu.concatenate %46, %4 in 0 : vector<1x128xbf16>, vector<1x128xbf16> -> vector<2x128xbf16>
    %cst_22 = arith.constant dense<0.000000e+00> : vector<2x128xf32>
    %48 = tpu.matmul %47, %45, %cst_22 {dimension_numbers = #tpu.dot_dimension_numbers<[1], [1], [0], [0], [0, 0, 1, 0], [], []>} : vector<2x128xbf16>, vector<128x128xbf16>, vector<2x128xf32> -> vector<2x128xf32>
    %49 = arith.addf %39, %48 : vector<2x128xf32>
    %50 = vector.extract_strided_slice %17 {offsets = [2, 0], sizes = [1, 128], strides = [1, 1]} : vector<8x128xf32> to vector<1x128xf32>
    %51 = vector.broadcast %50 : vector<1x128xf32> to vector<128x128xf32>
    %52 = arith.cmpf ogt, %51, %3 : vector<128x128xf32>
    %53 = arith.extui %52 : vector<128x128xi1> to vector<128x128xi32>
    %54 = arith.sitofp %53 : vector<128x128xi32> to vector<128x128xf32>
    %55 = arith.truncf %54 : vector<128x128xf32> to vector<128x128xbf16>
    %56 = vector.extract_strided_slice %28 {offsets = [2, 0], sizes = [1, 128], strides = [1, 1]} : vector<8x128xbf16> to vector<1x128xbf16>
    %57 = tpu.concatenate %56, %4 in 0 : vector<1x128xbf16>, vector<1x128xbf16> -> vector<2x128xbf16>
    %cst_23 = arith.constant dense<0.000000e+00> : vector<2x128xf32>
    %58 = tpu.matmul %57, %55, %cst_23 {dimension_numbers = #tpu.dot_dimension_numbers<[1], [1], [0], [0], [0, 0, 1, 0], [], []>} : vector<2x128xbf16>, vector<128x128xbf16>, vector<2x128xf32> -> vector<2x128xf32>
    %59 = arith.addf %49, %58 : vector<2x128xf32>
    %60 = vector.extract_strided_slice %17 {offsets = [3, 0], sizes = [1, 128], strides = [1, 1]} : vector<8x128xf32> to vector<1x128xf32>
    %61 = vector.broadcast %60 : vector<1x128xf32> to vector<128x128xf32>
    %62 = arith.cmpf ogt, %61, %3 : vector<128x128xf32>
    %63 = arith.extui %62 : vector<128x128xi1> to vector<128x128xi32>
    %64 = arith.sitofp %63 : vector<128x128xi32> to vector<128x128xf32>
    %65 = arith.truncf %64 : vector<128x128xf32> to vector<128x128xbf16>
    %66 = vector.extract_strided_slice %28 {offsets = [3, 0], sizes = [1, 128], strides = [1, 1]} : vector<8x128xbf16> to vector<1x128xbf16>
    %67 = tpu.concatenate %66, %4 in 0 : vector<1x128xbf16>, vector<1x128xbf16> -> vector<2x128xbf16>
    %cst_24 = arith.constant dense<0.000000e+00> : vector<2x128xf32>
    %68 = tpu.matmul %67, %65, %cst_24 {dimension_numbers = #tpu.dot_dimension_numbers<[1], [1], [0], [0], [0, 0, 1, 0], [], []>} : vector<2x128xbf16>, vector<128x128xbf16>, vector<2x128xf32> -> vector<2x128xf32>
    %69 = arith.addf %59, %68 : vector<2x128xf32>
    %70 = vector.extract_strided_slice %17 {offsets = [4, 0], sizes = [1, 128], strides = [1, 1]} : vector<8x128xf32> to vector<1x128xf32>
    %71 = vector.broadcast %70 : vector<1x128xf32> to vector<128x128xf32>
    %72 = arith.cmpf ogt, %71, %3 : vector<128x128xf32>
    %73 = arith.extui %72 : vector<128x128xi1> to vector<128x128xi32>
    %74 = arith.sitofp %73 : vector<128x128xi32> to vector<128x128xf32>
    %75 = arith.truncf %74 : vector<128x128xf32> to vector<128x128xbf16>
    %76 = vector.extract_strided_slice %28 {offsets = [4, 0], sizes = [1, 128], strides = [1, 1]} : vector<8x128xbf16> to vector<1x128xbf16>
    %77 = tpu.concatenate %76, %4 in 0 : vector<1x128xbf16>, vector<1x128xbf16> -> vector<2x128xbf16>
    %cst_25 = arith.constant dense<0.000000e+00> : vector<2x128xf32>
    %78 = tpu.matmul %77, %75, %cst_25 {dimension_numbers = #tpu.dot_dimension_numbers<[1], [1], [0], [0], [0, 0, 1, 0], [], []>} : vector<2x128xbf16>, vector<128x128xbf16>, vector<2x128xf32> -> vector<2x128xf32>
    %79 = arith.addf %69, %78 : vector<2x128xf32>
    %80 = vector.extract_strided_slice %17 {offsets = [5, 0], sizes = [1, 128], strides = [1, 1]} : vector<8x128xf32> to vector<1x128xf32>
    %81 = vector.broadcast %80 : vector<1x128xf32> to vector<128x128xf32>
    %82 = arith.cmpf ogt, %81, %3 : vector<128x128xf32>
    %83 = arith.extui %82 : vector<128x128xi1> to vector<128x128xi32>
    %84 = arith.sitofp %83 : vector<128x128xi32> to vector<128x128xf32>
    %85 = arith.truncf %84 : vector<128x128xf32> to vector<128x128xbf16>
    %86 = vector.extract_strided_slice %28 {offsets = [5, 0], sizes = [1, 128], strides = [1, 1]} : vector<8x128xbf16> to vector<1x128xbf16>
    %87 = tpu.concatenate %86, %4 in 0 : vector<1x128xbf16>, vector<1x128xbf16> -> vector<2x128xbf16>
    %cst_26 = arith.constant dense<0.000000e+00> : vector<2x128xf32>
    %88 = tpu.matmul %87, %85, %cst_26 {dimension_numbers = #tpu.dot_dimension_numbers<[1], [1], [0], [0], [0, 0, 1, 0], [], []>} : vector<2x128xbf16>, vector<128x128xbf16>, vector<2x128xf32> -> vector<2x128xf32>
    %89 = arith.addf %79, %88 : vector<2x128xf32>
    %90 = vector.extract_strided_slice %17 {offsets = [6, 0], sizes = [1, 128], strides = [1, 1]} : vector<8x128xf32> to vector<1x128xf32>
    %91 = vector.broadcast %90 : vector<1x128xf32> to vector<128x128xf32>
    %92 = arith.cmpf ogt, %91, %3 : vector<128x128xf32>
    %93 = arith.extui %92 : vector<128x128xi1> to vector<128x128xi32>
    %94 = arith.sitofp %93 : vector<128x128xi32> to vector<128x128xf32>
    %95 = arith.truncf %94 : vector<128x128xf32> to vector<128x128xbf16>
    %96 = vector.extract_strided_slice %28 {offsets = [6, 0], sizes = [1, 128], strides = [1, 1]} : vector<8x128xbf16> to vector<1x128xbf16>
    %97 = tpu.concatenate %96, %4 in 0 : vector<1x128xbf16>, vector<1x128xbf16> -> vector<2x128xbf16>
    %cst_27 = arith.constant dense<0.000000e+00> : vector<2x128xf32>
    %98 = tpu.matmul %97, %95, %cst_27 {dimension_numbers = #tpu.dot_dimension_numbers<[1], [1], [0], [0], [0, 0, 1, 0], [], []>} : vector<2x128xbf16>, vector<128x128xbf16>, vector<2x128xf32> -> vector<2x128xf32>
    %99 = arith.addf %89, %98 : vector<2x128xf32>
    %100 = vector.extract_strided_slice %17 {offsets = [7, 0], sizes = [1, 128], strides = [1, 1]} : vector<8x128xf32> to vector<1x128xf32>
    %101 = vector.broadcast %100 : vector<1x128xf32> to vector<128x128xf32>
    %102 = arith.cmpf ogt, %101, %3 : vector<128x128xf32>
    %103 = arith.extui %102 : vector<128x128xi1> to vector<128x128xi32>
    %104 = arith.sitofp %103 : vector<128x128xi32> to vector<128x128xf32>
    %105 = arith.truncf %104 : vector<128x128xf32> to vector<128x128xbf16>
    %106 = vector.extract_strided_slice %28 {offsets = [7, 0], sizes = [1, 128], strides = [1, 1]} : vector<8x128xbf16> to vector<1x128xbf16>
    %107 = tpu.concatenate %106, %4 in 0 : vector<1x128xbf16>, vector<1x128xbf16> -> vector<2x128xbf16>
    %cst_28 = arith.constant dense<0.000000e+00> : vector<2x128xf32>
    %108 = tpu.matmul %107, %105, %cst_28 {dimension_numbers = #tpu.dot_dimension_numbers<[1], [1], [0], [0], [0, 0, 1, 0], [], []>} : vector<2x128xbf16>, vector<128x128xbf16>, vector<2x128xf32> -> vector<2x128xf32>
    %109 = arith.addf %99, %108 : vector<2x128xf32>
    %c0_29 = arith.constant 0 : index
    %c0_30 = arith.constant 0 : index
    %110 = vector.load %arg5[%c0_29, %c0_30] : memref<2x128xf32, #tpu.memory_space<vmem>>, vector<2x128xf32>
    %111 = arith.addf %110, %109 : vector<2x128xf32>
    %c0_31 = arith.constant 0 : index
    %c0_32 = arith.constant 0 : index
    %112 = vector.load %arg5[%c0_31, %c0_32] : memref<2x128xf32, #tpu.memory_space<vmem>>, vector<2x128xf32>
    tpu.vector_store %arg5[%c0_31, %c0_32], %111 {strides = array<i32>} : memref<2x128xf32, #tpu.memory_space<vmem>>, vector<2x128xf32>,
    %c1_i32 = arith.constant 1 : i32
    %c0_i32_33 = arith.constant 0 : i32
    %113 = arith.cmpi eq, %arg0, %c0_i32_33 : i32
    %114 = arith.extui %113 : i1 to i32
    %c0_i32_34 = arith.constant 0 : i32
    %115 = arith.cmpi ne, %114, %c0_i32_34 : i32
    scf.if %115 {
      %c0_35 = arith.constant 0 : index
      %c0_36 = arith.constant 0 : index
      %116 = vector.load %arg5[%c0_35, %c0_36] : memref<2x128xf32, #tpu.memory_space<vmem>>, vector<2x128xf32>
      %c0_37 = arith.constant 0 : index
      %c0_38 = arith.constant 0 : index
      %117 = vector.load %arg6[%c0_37, %c0_38] : memref<8x128xf32, #tpu.memory_space<vmem>>, vector<8x128xf32>
      %cst_39 = arith.constant dense<0.000000e+00> : vector<128xf32>
      %118 = vector.multi_reduction <add>, %117, %cst_39 [0] : vector<8x128xf32> to vector<128xf32>
      %119 = vector.shape_cast %118 : vector<128xf32> to vector<1x128xf32>
      %c0_40 = arith.constant 0 : index
      %c0_41 = arith.constant 0 : index
      %120 = vector.load %arg7[%c0_40, %c0_41] : memref<8x128xf32, #tpu.memory_space<vmem>>, vector<8x128xf32>
      %cst_42 = arith.constant dense<0.000000e+00> : vector<128xf32>
      %121 = vector.multi_reduction <add>, %120, %cst_42 [0] : vector<8x128xf32> to vector<128xf32>
      %122 = vector.shape_cast %121 : vector<128xf32> to vector<1x128xf32>
      %c0_43 = arith.constant 0 : index
      %c0_44 = arith.constant 0 : index
      %123 = vector.load %arg8[%c0_43, %c0_44] : memref<8x128xf32, #tpu.memory_space<vmem>>, vector<8x128xf32>
      %cst_45 = arith.constant dense<0.000000e+00> : vector<128xf32>
      %124 = vector.multi_reduction <add>, %123, %cst_45 [0] : vector<8x128xf32> to vector<128xf32>
      %125 = vector.shape_cast %124 : vector<128xf32> to vector<1x128xf32>
      %cst_46 = arith.constant 0.000000e+00 : f32
      %126 = vector.broadcast %cst_46 : f32 to vector<3x128xf32>
      %127 = tpu.concatenate %116, %119, %122, %125, %126 in 0 : vector<2x128xf32>, vector<1x128xf32>, vector<1x128xf32>, vector<1x128xf32>, vector<3x128xf32> -> vector<8x128xf32>
      %c0_47 = arith.constant 0 : index
      %c0_48 = arith.constant 0 : index
      %128 = vector.load %arg4[%c0_47, %c0_48] : memref<8x128xf32, #tpu.memory_space<vmem>>, vector<8x128xf32>
      tpu.vector_store %arg4[%c0_47, %c0_48], %127 {strides = array<i32>} : memref<8x128xf32, #tpu.memory_space<vmem>>, vector<8x128xf32>,
    } else {
    }
    return
  }
  func.func @transform_0(%arg0: i32) -> (i32, i32) {
    %c0_i32 = arith.constant 0 : i32
    %c0_i32_0 = arith.constant 0 : i32
    %c0_i32_1 = arith.constant 0 : i32
    return %c0_i32, %c0_i32_0 : i32, i32
  }
  func.func @transform_1(%arg0: i32) -> (i32, i32) {
    %c0_i32 = arith.constant 0 : i32
    %c0_i32_0 = arith.constant 0 : i32
    return %arg0, %c0_i32 : i32, i32
  }
  func.func @transform_2(%arg0: i32) -> (i32, i32) {
    %c0_i32 = arith.constant 0 : i32
    %c0_i32_0 = arith.constant 0 : i32
    return %arg0, %c0_i32 : i32, i32
  }
  func.func @transform_3(%arg0: i32) -> (i32, i32) {
    %c0_i32 = arith.constant 0 : i32
    %c0_i32_0 = arith.constant 0 : i32
    %c0_i32_1 = arith.constant 0 : i32
    return %c0_i32, %c0_i32_0 : i32, i32
  }
}

</mosaic_0001>

<bundles_post_ra>
// kernel: tpu_custom_call.1
= control target key start
LH: loop header
LB: loop body
LE: loop exit
PB: predicated region body
PF: predicated region fallthrough
CT: control target
= control target key end

     0   :  { %8 = vsyncpa [#allocation7], 0  ;;  %s1623_s0 = inlined_call_operand.hbm [shape: f32[128,128], index: 0, kind: input, shape index: {}]   ;;  %s1624_s1 = inlined_call_operand.hbm [shape: f32[8,128], index: 1, kind: input, shape index: {}]   ;;  %s1625_s2 = inlined_call_operand.hbm [shape: f32[8,128], index: 2, kind: input, shape index: {}]   ;;  %s1626_s3 = inlined_call_operand.hbm [shape: f32[8,128], index: 3, kind: output, shape index: {}]  }
   0x1   :  { %9 = vsyncpa [#allocation10], 0  ;;  %s29_s14 = sshll.u32 %s1624_s1, 4  ;;  %s30_s14 = int_to_ptr.hbm [resolvable:$true] %s29_s14 }
   0x2   :  { %10 = vsyncpa [#allocation8], 0  ;;  %s1136_s15 = smov [#allocation9]   ;;  %s15_s19 = sshll.u32 %s1623_s0, 4  ;;  %s16_s19 = int_to_ptr.hbm [resolvable:$true] %s15_s19 }
   0x3   :  { %s31_s16 = sshll.u32 %s1136_s15, 4  ;;  %s1137_s20 = smov [#allocation6]   ;;  %s32_s16 = int_to_ptr.vmem [resolvable:$true] %s31_s16 }
   0x4   :  { %34 = dma.hbm_to_vmem [thread:$0]  %s30_s14, 128, %s32_s16, [#allocation10]  }
   0x5   :  { %s17_s21 = sshll.u32 %s1137_s20, 4  ;;  %s1138_s22 = smov 128   ;;  %s18_s21 = int_to_ptr.vmem [resolvable:$true] %s17_s21 }
   0x6   :  { %s1139_s23 = smov 8   ;;  %s40_s1 = sshll.u32 %s1625_s2, 4  ;;  %s41_s1 = int_to_ptr.hbm [resolvable:$true] %s40_s1 }
   0x7   :  { %23 = dma.hbm_to_vmem [thread:$0]  %s16_s19, 2048, %s18_s21, [#allocation7], %s1138_s22, %s1138_s22, %s1139_s23  }
   0x8   :  { %s1140_s26 = smov [#allocation11]  }
   0x9   :  { %s42_s27 = sshll.u32 %s1140_s26, 4  ;;  %s43_s27 = int_to_ptr.vmem [resolvable:$true] %s42_s27 }
   0xa   :  { %45 = dma.hbm_to_vmem [thread:$0]  %s41_s1, 128, %s43_s27, [#allocation10]  }
   0xb   :  { %1130 = dma.done.wait [#allocation7], 2048  }
   0xc   :  { %1131 = vsyncadd [#allocation7], 4294965248 }
   0xd   :  { %1132 = dma.done.wait [#allocation10], 256  }
   0xe   :  { %1133 = vsyncadd [#allocation10], 4294967040  ;;  %v83_v0 = vld [vmem:[#allocation9] sm:$0xff]  ;;  %v1173_v14 = vld [vmem:[#allocation6 + $0x70] sm:$0xff]  ;;  %v1141_v23 = vmov 1.0|1.0  }
   0xf   :  { %v85_v1 = vsub.f32 0.0, %v83_v0  ;;  %v1175_v15 = vld [vmem:[#allocation6 + $0x78] sm:$0xff]  ;;  %v1207_v21 = vld [vmem:[#allocation6 + $0x60] sm:$0xff]  ;;  %v1209_v22 = vld [vmem:[#allocation6 + $0x68] sm:$0xff]  ;;  %s1143_s0 = smov [#allocation12]   ;;  %s755_s30 = sshll.u32 %s1626_s3, 4  ;;  %s756_s30 = int_to_ptr.hbm [resolvable:$true] %s755_s30 }
  0x10   :  { %v1231_v24 = vld [vmem:[#allocation6 + $0x50] sm:$0xff]  ;;  %v1233_v25 = vld [vmem:[#allocation6 + $0x58] sm:$0xff]  ;;  %v1255_v26 = vld [vmem:[#allocation6 + $0x40] sm:$0xff]  ;;  %s753_s2 = sshll.u32 %s1143_s0, 4  ;;  %s754_s2 = int_to_ptr.vmem [resolvable:$true] %s753_s2 }
  0x11   :  { %v86_v2 = vmul.f32 1.442695, %v85_v1  ;;  %v1257_v27 = vld [vmem:[#allocation6 + $0x48] sm:$0xff]  ;;  %v1279_v28 = vld [vmem:[#allocation6 + $0x30] sm:$0xff]  ;;  %v1281_v29 = vld [vmem:[#allocation6 + $0x38] sm:$0xff] }
  0x12   :  { %v1303_v30 = vld [vmem:[#allocation6 + $0x20] sm:$0xff]  ;;  %v1305_v31 = vld [vmem:[#allocation6 + $0x28] sm:$0xff]  ;;  %v1327_v32 = vld [vmem:[#allocation6 + $0x10] sm:$0xff] }
  0x13   :  { %1030 = vpow2.f32 %v86_v2  ;;  %v1329_v33 = vld [vmem:[#allocation6 + $0x18] sm:$0xff]  ;;  %v1347_v34 = vld [vmem:[#allocation6] sm:$0xff]  ;;  %v1349_v35 = vld [vmem:[#allocation6 + $0x8] sm:$0xff] }
  0x14   :  { %v1426_v44 = vld [vmem:[#allocation11] sm:$0xff] }
  0x15   :  { %v114_v45 = vpack.c.bf16 %v1426_v44, %v1426_v44 }
  0x17   :  { %v234_v46 = vunpack.c.l.b16 %v114_v45 }
  0x19   :  { %v1031_v3 = vpop.eup %1030  ;;  %v1455_v47 = vpack.c.b16 %v234_v46, %v234_v46 }
  0x1a   :  { %v88_v4 = vadd.f32 1.0, %v1031_v3 }
  0x1b   :  { %v324_v49 = vrot.slane %v1455_v47, 1  ;;  %v1464_v50 = vshrl.u32 %v1455_v47, 16  ;;  %v472_v56 = vrot.slane %v1455_v47, 2  ;;  %v620_v58 = vrot.slane %v1455_v47, 3 }
  0x1c   :  { %1032 = vrcp.f32 %v88_v4  ;;  %v100_v7 = vand.u32 2147483648, %v88_v4  ;;  %vm94_vm0 = vweird.f32 %v88_v4  ;;  %v98_v9 = vand.u32 2147483647, %v88_v4 }
  0x1d   :  { %v398_v52 = vrot.slane %v1464_v50, 1  ;;  %v546_v57 = vrot.slane %v1464_v50, 2  ;;  %v694_v59 = vrot.slane %v1464_v50, 3 }
  0x1e   :  { %v101_v11 = vor.u32 1.1754944e-38, %v100_v7  ;;  %vm99_vm3 = vcmp.eq.f32.partialorder %v98_v9, 8.507059e+37 }
  0x22   :  { %v1033_v5 = vpop.eup %1032 }
  0x23   :  { %v90_v6 = vmul.f32 %v1033_v5, %v88_v4  ;;  %vm95_vm1 = vweird.f32 %v1033_v5 }
  0x24   :  { %vm96_vm2 = vmor %vm94_vm0, %vm95_vm1 }
  0x25   :  { %v91_v8 = vsub.f32 1.0, %v90_v6 }
  0x27   :  { %v92_v10 = vmul.f32 %v1033_v5, %v91_v8  ;;  %v1142_v8 = vmov 0.0  }
  0x28   :  { %63 = vst [vmem:[#allocation2] sm:$0x3] %v1142_v8 }
  0x29   :  { %v93_v12 = vadd.f32 %v1033_v5, %v92_v10 }
  0x2b   :  { %v97_v13 = vsel %vm96_vm2, %v1033_v5, %v93_v12  ;;  %v719_v12 = vrot.slane %v1426_v44, 4 }
  0x2c   :  { %v1177_v16 = vsel %vm99_vm3, %v101_v11, %v97_v13 }
  0x2d   :  { %v1180_v17 = vperm.slane %v1177_v16, 1  ;;  %v1183_v18 = vperm.slane %v1177_v16, 0  ;;  %v1186_v19 = vperm.slane %v1177_v16, 2  ;;  %v1189_v20 = vperm.slane %v1177_v16, 3 }
  0x2e   :  { %v1360_v36 = vperm.slane %v1177_v16, 4  ;;  %v1368_v37 = vperm.slane %v1177_v16, 5  ;;  %v1376_v38 = vperm.slane %v1177_v16, 6  ;;  %v1388_v40 = vperm.slane %v1177_v16, 7 }
  0x2f   :  { %vm191_vm4 = vcmp.gt.f32.partialorder %v1180_v17, %v1173_v14  ;;  %vm192_vm5 = vcmp.gt.f32.partialorder %v1180_v17, %v1175_v15  ;;  %vm130_vm6 = vcmp.gt.f32.partialorder %v1183_v18, %v1173_v14  ;;  %vm131_vm7 = vcmp.gt.f32.partialorder %v1183_v18, %v1175_v15 }
  0x30   :  { %vm798_vm8 = vmpackc.low %vm192_vm5, %vm191_vm4  ;;  %vm282_vm9 = vcmp.gt.f32.partialorder %v1186_v19, %v1173_v14  ;;  %vm283_vm10 = vcmp.gt.f32.partialorder %v1186_v19, %v1175_v15  ;;  %vm356_vm11 = vcmp.gt.f32.partialorder %v1189_v20, %v1173_v14  ;;  %vm357_vm12 = vcmp.gt.f32.partialorder %v1189_v20, %v1175_v15 }
  0x31   :  { %799 = vmatpush.bf16.xpose.msk.msra.mxu0 %vm798_vm8, %v1141_v23  ;;  %vm814_vm13 = vmpackc.low %vm131_vm7, %vm130_vm6  ;;  %vm189_vm0 = vcmp.gt.f32.partialorder %v1180_v17, %v1207_v21  ;;  %vm190_vm1 = vcmp.gt.f32.partialorder %v1180_v17, %v1209_v22  ;;  %vm128_vm2 = vcmp.gt.f32.partialorder %v1183_v18, %v1207_v21  ;;  %vm129_vm3 = vcmp.gt.f32.partialorder %v1183_v18, %v1209_v22 }
  0x32   :  { %815 = vmatpush.bf16.xpose.msk.msra.mxu1 %vm814_vm13, %v1141_v23  ;;  %vm846_vm14 = vmpackc.low %vm283_vm10, %vm282_vm9  ;;  %vm280_vm4 = vcmp.gt.f32.partialorder %v1186_v19, %v1207_v21  ;;  %vm281_vm5 = vcmp.gt.f32.partialorder %v1186_v19, %v1209_v22  ;;  %vm354_vm7 = vcmp.gt.f32.partialorder %v1189_v20, %v1207_v21  ;;  %vm355_vm8 = vcmp.gt.f32.partialorder %v1189_v20, %v1209_v22 }
  0x33   :  { %847 = vmatpush.bf16.xpose.msk.msra.mxu2 %vm846_vm14, %v1141_v23  ;;  %vm878_vm15 = vmpackc.low %vm357_vm12, %vm356_vm11  ;;  %vm187_vm12 = vcmp.gt.f32.partialorder %v1180_v17, %v1231_v24  ;;  %vm188_vm13 = vcmp.gt.f32.partialorder %v1180_v17, %v1233_v25  ;;  %vm126_vm14 = vcmp.gt.f32.partialorder %v1183_v18, %v1231_v24  ;;  %v108_v10 = vmul.f32 %v1177_v16, %v1426_v44 }
  0x34   :  { %879 = vmatpush.bf16.xpose.msk.msra.mxu3 %vm878_vm15, %v1141_v23  ;;  %vm800_vm6 = vmpackc.low %vm190_vm1, %vm189_vm0  ;;  %vm127_vm15 = vcmp.gt.f32.partialorder %v1183_v18, %v1233_v25  ;;  %vm278_vm0 = vcmp.gt.f32.partialorder %v1186_v19, %v1231_v24  ;;  %vm279_vm1 = vcmp.gt.f32.partialorder %v1186_v19, %v1233_v25 }
  0x35   :  { %vm816_vm9 = vmpackc.low %vm129_vm3, %vm128_vm2  ;;  %vm352_vm3 = vcmp.gt.f32.partialorder %v1189_v20, %v1231_v24 }
  0x36   :  { %vm848_vm10 = vmpackc.low %vm281_vm5, %vm280_vm4  ;;  %vm353_vm4 = vcmp.gt.f32.partialorder %v1189_v20, %v1233_v25 }
  0x37   :  { %vm880_vm11 = vmpackc.low %vm355_vm8, %vm354_vm7  ;;  %vm185_vm8 = vcmp.gt.f32.partialorder %v1180_v17, %v1255_v26 }
  0x38   :  { %vm802_vm2 = vmpackc.low %vm188_vm13, %vm187_vm12  ;;  %vm276_vm12 = vcmp.gt.f32.partialorder %v1186_v19, %v1255_v26  ;;  %vm277_vm13 = vcmp.gt.f32.partialorder %v1186_v19, %v1257_v27 }
  0x39   :  { %801 = vmatpush.bf16.xpose.msk.msra.mxu0 %vm800_vm6, %v1141_v23  ;;  %vm818_vm5 = vmpackc.low %vm127_vm15, %vm126_vm14  ;;  %vm350_vm15 = vcmp.gt.f32.partialorder %v1189_v20, %v1255_v26 }
  0x3a   :  { %817 = vmatpush.bf16.xpose.msk.msra.mxu1 %vm816_vm9, %v1141_v23  ;;  %vm850_vm6 = vmpackc.low %vm279_vm1, %vm278_vm0  ;;  %vm186_vm9 = vcmp.gt.f32.partialorder %v1180_v17, %v1257_v27  ;;  %vm351_vm0 = vcmp.gt.f32.partialorder %v1189_v20, %v1257_v27 }
  0x3b   :  { %849 = vmatpush.bf16.xpose.msk.msra.mxu2 %vm848_vm10, %v1141_v23  ;;  %vm882_vm7 = vmpackc.low %vm353_vm4, %vm352_vm3  ;;  %vm124_vm10 = vcmp.gt.f32.partialorder %v1183_v18, %v1255_v26  ;;  %vm183_vm4 = vcmp.gt.f32.partialorder %v1180_v17, %v1279_v28 }
  0x3c   :  { %881 = vmatpush.bf16.xpose.msk.msra.mxu3 %vm880_vm11, %v1141_v23  ;;  %vm125_vm11 = vcmp.gt.f32.partialorder %v1183_v18, %v1257_v27  ;;  %vm804_vm14 = vmpackc.low %vm186_vm9, %vm185_vm8  ;;  %vm274_vm8 = vcmp.gt.f32.partialorder %v1186_v19, %v1279_v28  ;;  %vm275_vm9 = vcmp.gt.f32.partialorder %v1186_v19, %v1281_v29 }
  0x3d   :  { %vm820_vm1 = vmpackc.low %vm125_vm11, %vm124_vm10  ;;  %vm348_vm11 = vcmp.gt.f32.partialorder %v1189_v20, %v1279_v28 }
  0x3e   :  { %vm884_vm3 = vmpackc.low %vm351_vm0, %vm350_vm15  ;;  %vm181_vm0 = vcmp.gt.f32.partialorder %v1180_v17, %v1303_v30 }
  0x41   :  { %803 = vmatpush.bf16.xpose.msk.msra.mxu0 %vm802_vm2, %v1141_v23  ;;  %vm852_vm2 = vmpackc.low %vm277_vm13, %vm276_vm12  ;;  %vm349_vm12 = vcmp.gt.f32.partialorder %v1189_v20, %v1281_v29 }
  0x42   :  { %819 = vmatpush.bf16.xpose.msk.msra.mxu1 %vm818_vm5, %v1141_v23  ;;  %vm184_vm5 = vcmp.gt.f32.partialorder %v1180_v17, %v1281_v29  ;;  %vm886_vm15 = vmpackc.low %vm349_vm12, %vm348_vm11  ;;  %vm179_vm12 = vcmp.gt.f32.partialorder %v1180_v17, %v1327_v32 }
  0x43   :  { %851 = vmatpush.bf16.xpose.msk.msra.mxu2 %vm850_vm6, %v1141_v23  ;;  %vm122_vm6 = vcmp.gt.f32.partialorder %v1183_v18, %v1279_v28  ;;  %vm806_vm10 = vmpackc.low %vm184_vm5, %vm183_vm4  ;;  %vm272_vm4 = vcmp.gt.f32.partialorder %v1186_v19, %v1303_v30  ;;  %vm273_vm5 = vcmp.gt.f32.partialorder %v1186_v19, %v1305_v31 }
  0x44   :  { %883 = vmatpush.bf16.xpose.msk.msra.mxu3 %vm882_vm7, %v1141_v23  ;;  %vm123_vm7 = vcmp.gt.f32.partialorder %v1183_v18, %v1281_v29 }
  0x45   :  { %vm822_vm13 = vmpackc.low %vm123_vm7, %vm122_vm6  ;;  %vm346_vm7 = vcmp.gt.f32.partialorder %v1189_v20, %v1303_v30 }
  0x49   :  { %805 = vmatpush.bf16.xpose.msk.msra.mxu0 %vm804_vm14, %v1141_v23  ;;  %vm854_vm14 = vmpackc.low %vm275_vm9, %vm274_vm8  ;;  %vm347_vm8 = vcmp.gt.f32.partialorder %v1189_v20, %v1305_v31 }
  0x4a   :  { %821 = vmatpush.bf16.xpose.msk.msra.mxu1 %vm820_vm1, %v1141_v23  ;;  %vm182_vm1 = vcmp.gt.f32.partialorder %v1180_v17, %v1305_v31  ;;  %vm888_vm11 = vmpackc.low %vm347_vm8, %vm346_vm7  ;;  %vm177_vm7 = vcmp.gt.f32.partialorder %v1180_v17, %v1347_v34  ;;  %vm178_vm8 = vcmp.gt.f32.partialorder %v1180_v17, %v1349_v35 }
  0x4b   :  { %853 = vmatpush.bf16.xpose.msk.msra.mxu2 %vm852_vm2, %v1141_v23  ;;  %vm120_vm2 = vcmp.gt.f32.partialorder %v1183_v18, %v1303_v30  ;;  %vm808_vm6 = vmpackc.low %vm182_vm1, %vm181_vm0  ;;  %vm270_vm0 = vcmp.gt.f32.partialorder %v1186_v19, %v1327_v32  ;;  %vm271_vm1 = vcmp.gt.f32.partialorder %v1186_v19, %v1329_v33 }
  0x4c   :  { %885 = vmatpush.bf16.xpose.msk.msra.mxu3 %vm884_vm3, %v1141_v23  ;;  %vm121_vm3 = vcmp.gt.f32.partialorder %v1183_v18, %v1305_v31 }
  0x4d   :  { %vm824_vm9 = vmpackc.low %vm121_vm3, %vm120_vm2  ;;  %vm344_vm3 = vcmp.gt.f32.partialorder %v1189_v20, %v1327_v32 }
  0x51   :  { %807 = vmatpush.bf16.xpose.msk.msra.mxu0 %vm806_vm10, %v1141_v23  ;;  %vm856_vm10 = vmpackc.low %vm273_vm5, %vm272_vm4  ;;  %vm345_vm4 = vcmp.gt.f32.partialorder %v1189_v20, %v1329_v33 }
  0x52   :  { %823 = vmatpush.bf16.xpose.msk.msra.mxu1 %vm822_vm13, %v1141_v23  ;;  %vm180_vm13 = vcmp.gt.f32.partialorder %v1180_v17, %v1329_v33 }
  0x53   :  { %855 = vmatpush.bf16.xpose.msk.msra.mxu2 %vm854_vm14, %v1141_v23  ;;  %vm118_vm14 = vcmp.gt.f32.partialorder %v1183_v18, %v1327_v32  ;;  %vm810_vm2 = vmpackc.low %vm180_vm13, %vm179_vm12  ;;  %vm268_vm12 = vcmp.gt.f32.partialorder %v1186_v19, %v1347_v34  ;;  %vm269_vm13 = vcmp.gt.f32.partialorder %v1186_v19, %v1349_v35 }
  0x54   :  { %887 = vmatpush.bf16.xpose.msk.msra.mxu3 %vm886_vm15, %v1141_v23  ;;  %vm119_vm15 = vcmp.gt.f32.partialorder %v1183_v18, %v1329_v33 }
  0x55   :  { %vm826_vm5 = vmpackc.low %vm119_vm15, %vm118_vm14  ;;  %vm342_vm15 = vcmp.gt.f32.partialorder %v1189_v20, %v1347_v34 }
  0x56   :  { %vm1379_vm14 = vmpackc.low %vm178_vm8, %vm177_vm7  ;;  %vm578_vm8 = vcmp.gt.f32.partialorder %v1376_v38, %v1173_v14 }
  0x59   :  { %809 = vmatpush.bf16.xpose.msk.msra.mxu0 %vm808_vm6, %v1141_v23  ;;  %vm858_vm6 = vmpackc.low %vm271_vm1, %vm270_vm0  ;;  %vm343_vm0 = vcmp.gt.f32.partialorder %v1189_v20, %v1349_v35  ;;  %v720_v20 = vadd.f32 %v719_v12, %v1426_v44 }
  0x5a   :  { %825 = vmatpush.bf16.xpose.msk.msra.mxu1 %vm824_vm9, %v1141_v23  ;;  %vm890_vm9 = vmpackc.low %vm345_vm4, %vm344_vm3  ;;  %vm431_vm3 = vcmp.gt.f32.partialorder %v1360_v36, %v1175_v15 }
  0x5b   :  { %857 = vmatpush.bf16.xpose.msk.msra.mxu2 %vm856_vm10, %v1141_v23  ;;  %vm116_vm10 = vcmp.gt.f32.partialorder %v1183_v18, %v1347_v34  ;;  %vm1399_vm4 = vmpackc.low %vm269_vm13, %vm268_vm12  ;;  %vm653_vm12 = vcmp.gt.f32.partialorder %v1388_v40, %v1175_v15 }
  0x5c   :  { %889 = vmatpush.bf16.xpose.msk.msra.mxu3 %vm888_vm11, %v1141_v23  ;;  %vm117_vm11 = vcmp.gt.f32.partialorder %v1183_v18, %v1349_v35  ;;  %vm1407_vm7 = vmpackc.low %vm343_vm0, %vm342_vm15  ;;  %v733_v18 = vrot.slane %v1177_v16, 4 }
  0x5d   :  { %vm1391_vm1 = vmpackc.low %vm117_vm11, %vm116_vm10  ;;  %vm652_vm11 = vcmp.gt.f32.partialorder %v1388_v40, %v1173_v14 }
  0x5e   :  { %vm1006_vm0 = vmpackc.low %vm653_vm12, %vm652_vm11  ;;  %vm651_vm11 = vcmp.gt.f32.partialorder %v1388_v40, %v1209_v22 }
  0x61   :  { %811 = vmatpush.bf16.xpose.msk.msra.mxu0 %vm810_vm2, %v1141_v23  ;;  %vm430_vm2 = vcmp.gt.f32.partialorder %v1360_v36, %v1173_v14 }
  0x62   :  { %827 = vmatpush.bf16.xpose.msk.msra.mxu1 %vm826_vm5, %v1141_v23  ;;  %vm504_vm5 = vcmp.gt.f32.partialorder %v1368_v37, %v1173_v14  ;;  %vm910_vm10 = vmpackc.low %vm431_vm3, %vm430_vm2  ;;  %vm428_vm2 = vcmp.gt.f32.partialorder %v1360_v36, %v1207_v21  ;;  %vm503_vm3 = vcmp.gt.f32.partialorder %v1368_v37, %v1209_v22  ;;  %v726_v14 = vrot.slane %v108_v10, 4 }
  0x63   :  { %859 = vmatpush.bf16.xpose.msk.msra.mxu2 %vm858_vm6, %v1141_v23  ;;  %vm505_vm6 = vcmp.gt.f32.partialorder %v1368_v37, %v1175_v15 }
  0x64   :  { %891 = vmatpush.bf16.xpose.msk.msra.mxu3 %vm890_vm9, %v1141_v23  ;;  %vm579_vm9 = vcmp.gt.f32.partialorder %v1376_v38, %v1175_v15  ;;  %vm942_vm13 = vmpackc.low %vm505_vm6, %vm504_vm5  ;;  %vm577_vm5 = vcmp.gt.f32.partialorder %v1376_v38, %v1209_v22 }
  0x65   :  { %vm974_vm15 = vmpackc.low %vm579_vm9, %vm578_vm8  ;;  %vm173_vm8 = vsmask.f32 256 }
  0x69   :  { %813 = vmatpush.bf16.xpose.msk.msra.mxu0 %vm1379_vm14, %v1141_v23  ;;  %vm429_vm14 = vcmp.gt.f32.partialorder %v1360_v36, %v1209_v22  ;;  %v734_v22 = vadd.f32 %v733_v18, %v1177_v16 }
  0x6a   :  { %829 = vmatpush.bf16.xpose.msk.msra.mxu1 %vm1391_vm1, %v1141_v23  ;;  %vm502_vm1 = vcmp.gt.f32.partialorder %v1368_v37, %v1207_v21  ;;  %vm912_vm6 = vmpackc.low %vm429_vm14, %vm428_vm2  ;;  %vm427_vm2 = vcmp.gt.f32.partialorder %v1360_v36, %v1233_v25  ;;  %vm500_vm14 = vcmp.gt.f32.partialorder %v1368_v37, %v1231_v24 }
  0x6b   :  { %861 = vmatpush.bf16.xpose.msk.msra.mxu2 %vm1399_vm4, %v1141_v23  ;;  %vm576_vm4 = vcmp.gt.f32.partialorder %v1376_v38, %v1207_v21  ;;  %vm944_vm9 = vmpackc.low %vm503_vm3, %vm502_vm1  ;;  %vm501_vm1 = vcmp.gt.f32.partialorder %v1368_v37, %v1233_v25  ;;  %vm574_vm3 = vcmp.gt.f32.partialorder %v1376_v38, %v1231_v24 }
  0x6c   :  { %893 = vmatpush.bf16.xpose.msk.msra.mxu3 %vm1407_vm7, %v1141_v23  ;;  %vm172_vm7 = vcmask 1040384   ;;  %vm976_vm12 = vmpackc.low %vm577_vm5, %vm576_vm4  ;;  %vm575_vm4 = vcmp.gt.f32.partialorder %v1376_v38, %v1233_v25 }
  0x71   :  { %911 = vmatpush.bf16.xpose.msk.msrb.mxu0 %vm910_vm10, %v1141_v23  ;;  %vm650_vm10 = vcmp.gt.f32.partialorder %v1388_v40, %v1207_v21  ;;  %v727_v21 = vadd.f32 %v726_v14, %v108_v10 }
  0x72   :  { %943 = vmatpush.bf16.xpose.msk.msrb.mxu1 %vm942_vm13, %v1141_v23  ;;  %vm1457_vm13 = vmand %vm172_vm7, %vm173_vm8  ;;  %vm649_vm7 = vcmp.gt.f32.partialorder %v1388_v40, %v1233_v25 }
  0x73   :  { %975 = vmatpush.bf16.xpose.msk.msrb.mxu2 %vm974_vm15, %v1141_v23  ;;  %vm1008_vm15 = vmpackc.low %vm651_vm11, %vm650_vm10  ;;  %v326_v51 = vsel %vm1457_vm13, %v324_v49, 1065369472  ;;  %v240_v53 = vsel %vm1457_vm13, %v1464_v50, 1065369472  ;;  %v175_v54 = vsel %vm1457_vm13, %v114_v45, 1065369472  ;;  %vm424_vm11 = vcmp.gt.f32.partialorder %v1360_v36, %v1255_v26 }
  0x74   :  { %1007 = vmatpush.bf16.xpose.msk.msrb.mxu3 %vm1006_vm0, %v1141_v23  ;;  %vm426_vm0 = vcmp.gt.f32.partialorder %v1360_v36, %v1231_v24  ;;  %335 = vmatmul.bf16.vlgmr.msra.gmra.mxu2 %v326_v51  ;;  %v400_v55 = vsel %vm1457_vm13, %v398_v52, 1065369472  ;;  %vm946_vm8 = vmpackc.low %vm501_vm1, %vm500_vm14  ;;  %vm573_vm14 = vcmp.gt.f32.partialorder %v1376_v38, %v1257_v27  ;;  %v474_v60 = vsel %vm1457_vm13, %v472_v56, 1065369472 }
  0x75   :  { %249 = vmatmul.bf16.vlgmr.msra.gmra.mxu0 %v240_v53  ;;  %262 = vmatmul.bf16.vlgmr.msra.gmra.mxu1 %v175_v54  ;;  %vm914_vm5 = vmpackc.low %vm427_vm2, %vm426_vm0  ;;  %vm499_vm0 = vcmp.gt.f32.partialorder %v1368_v37, %v1257_v27  ;;  %vm572_vm2 = vcmp.gt.f32.partialorder %v1376_v38, %v1255_v26  ;;  %v548_v61 = vsel %vm1457_vm13, %v546_v57, 1065369472  ;;  %v622_v62 = vsel %vm1457_vm13, %v620_v58, 1065369472 }
  0x76   :  { %409 = vmatmul.bf16.vlgmr.msra.gmra.mxu3 %v400_v55  ;;  %v696_v63 = vsel %vm1457_vm13, %v694_v59, 1065369472  ;;  %vm739_vm13 = vcmask 1041408  }
  0x79   :  { %913 = vmatpush.bf16.xpose.msk.msrb.mxu0 %vm912_vm6, %v1141_v23  ;;  %vm648_vm6 = vcmp.gt.f32.partialorder %v1388_v40, %v1231_v24  ;;  %v721_v24 = vrot.slane %v720_v20, 2 }
  0x7a   :  { %945 = vmatpush.bf16.xpose.msk.msrb.mxu1 %vm944_vm9, %v1141_v23  ;;  %vm978_vm9 = vmpackc.low %vm575_vm4, %vm574_vm3  ;;  %vm646_vm3 = vcmp.gt.f32.partialorder %v1388_v40, %v1255_v26  ;;  %vm647_vm4 = vcmp.gt.f32.partialorder %v1388_v40, %v1257_v27 }
  0x7b   :  { %977 = vmatpush.bf16.xpose.msk.msrb.mxu2 %vm976_vm12, %v1141_v23  ;;  %vm1010_vm10 = vmpackc.low %vm649_vm7, %vm648_vm6  ;;  %vm425_vm12 = vcmp.gt.f32.partialorder %v1360_v36, %v1257_v27  ;;  %v728_v27 = vrot.slane %v727_v21, 2 }
  0x7c   :  { %1009 = vmatpush.bf16.xpose.msk.msrb.mxu3 %vm1008_vm15, %v1141_v23  ;;  %vm498_vm15 = vcmp.gt.f32.partialorder %v1368_v37, %v1255_v26  ;;  %vm916_vm1 = vmpackc.low %vm425_vm12, %vm424_vm11  ;;  %vm497_vm11 = vcmp.gt.f32.partialorder %v1368_v37, %v1281_v29  ;;  %vm570_vm12 = vcmp.gt.f32.partialorder %v1376_v38, %v1279_v28 }
  0x7d   :  { %vm980_vm6 = vmpackc.low %vm573_vm14, %vm572_vm2  ;;  %vm644_vm2 = vcmp.gt.f32.partialorder %v1388_v40, %v1279_v28  ;;  %vm645_vm14 = vcmp.gt.f32.partialorder %v1388_v40, %v1281_v29 }
  0x7e   :  { %vm1012_vm7 = vmpackc.low %vm647_vm4, %vm646_vm3 }
  0x7f   :  { %vm1014_vm4 = vmpackc.low %vm645_vm14, %vm644_vm2 }
  0x81   :  { %915 = vmatpush.bf16.xpose.msk.msrb.mxu0 %vm914_vm5, %v1141_v23  ;;  %vm948_vm5 = vmpackc.low %vm499_vm0, %vm498_vm15  ;;  %vm571_vm15 = vcmp.gt.f32.partialorder %v1376_v38, %v1281_v29 }
  0x82   :  { %947 = vmatpush.bf16.xpose.msk.msrb.mxu1 %vm946_vm8, %v1141_v23  ;;  %vm422_vm8 = vcmp.gt.f32.partialorder %v1360_v36, %v1279_v28  ;;  %vm982_vm3 = vmpackc.low %vm571_vm15, %vm570_vm12  ;;  %vm642_vm12 = vcmp.gt.f32.partialorder %v1388_v40, %v1303_v30  ;;  %vm643_vm15 = vcmp.gt.f32.partialorder %v1388_v40, %v1305_v31 }
  0x83   :  { %979 = vmatpush.bf16.xpose.msk.msrb.mxu2 %vm978_vm9, %v1141_v23  ;;  %vm423_vm9 = vcmp.gt.f32.partialorder %v1360_v36, %v1281_v29  ;;  %vm1016_vm14 = vmpackc.low %vm643_vm15, %vm642_vm12 }
  0x84   :  { %1011 = vmatpush.bf16.xpose.msk.msrb.mxu3 %vm1010_vm10, %v1141_v23  ;;  %vm496_vm10 = vcmp.gt.f32.partialorder %v1368_v37, %v1279_v28  ;;  %vm918_vm0 = vmpackc.low %vm423_vm9, %vm422_vm8  ;;  %vm495_vm8 = vcmp.gt.f32.partialorder %v1368_v37, %v1305_v31  ;;  %vm568_vm9 = vcmp.gt.f32.partialorder %v1376_v38, %v1303_v30 }
  0x89   :  { %917 = vmatpush.bf16.xpose.msk.msrb.mxu0 %vm916_vm1, %v1141_v23  ;;  %vm950_vm1 = vmpackc.low %vm497_vm11, %vm496_vm10  ;;  %vm569_vm10 = vcmp.gt.f32.partialorder %v1376_v38, %v1305_v31 }
  0x8a   :  { %949 = vmatpush.bf16.xpose.msk.msrb.mxu1 %vm948_vm5, %v1141_v23  ;;  %vm420_vm5 = vcmp.gt.f32.partialorder %v1360_v36, %v1303_v30  ;;  %vm984_vm2 = vmpackc.low %vm569_vm10, %vm568_vm9  ;;  %vm640_vm9 = vcmp.gt.f32.partialorder %v1388_v40, %v1327_v32  ;;  %vm641_vm10 = vcmp.gt.f32.partialorder %v1388_v40, %v1329_v33 }
  0x8b   :  { %981 = vmatpush.bf16.xpose.msk.msrb.mxu2 %vm980_vm6, %v1141_v23  ;;  %vm421_vm6 = vcmp.gt.f32.partialorder %v1360_v36, %v1305_v31  ;;  %vm1018_vm15 = vmpackc.low %vm641_vm10, %vm640_vm9  ;;  %v735_v31 = vrot.slane %v734_v22, 2 }
  0x8c   :  { %1013 = vmatpush.bf16.xpose.msk.msrb.mxu3 %vm1012_vm7, %v1141_v23  ;;  %vm494_vm7 = vcmp.gt.f32.partialorder %v1368_v37, %v1303_v30  ;;  %vm920_vm11 = vmpackc.low %vm421_vm6, %vm420_vm5  ;;  %vm493_vm5 = vcmp.gt.f32.partialorder %v1368_v37, %v1329_v33  ;;  %vm566_vm6 = vcmp.gt.f32.partialorder %v1376_v38, %v1327_v32 }
  0x91   :  { %919 = vmatpush.bf16.xpose.msk.msrb.mxu0 %vm918_vm0, %v1141_v23  ;;  %vm952_vm0 = vmpackc.low %vm495_vm8, %vm494_vm7  ;;  %vm567_vm7 = vcmp.gt.f32.partialorder %v1376_v38, %v1329_v33 }
  0x92   :  { %951 = vmatpush.bf16.xpose.msk.msrb.mxu1 %vm950_vm1, %v1141_v23  ;;  %vm418_vm1 = vcmp.gt.f32.partialorder %v1360_v36, %v1327_v32  ;;  %vm986_vm12 = vmpackc.low %vm567_vm7, %vm566_vm6  ;;  %vm638_vm6 = vcmp.gt.f32.partialorder %v1388_v40, %v1347_v34  ;;  %vm639_vm7 = vcmp.gt.f32.partialorder %v1388_v40, %v1349_v35 }
  0x93   :  { %983 = vmatpush.bf16.xpose.msk.msrb.mxu2 %vm982_vm3, %v1141_v23  ;;  %vm419_vm3 = vcmp.gt.f32.partialorder %v1360_v36, %v1329_v33  ;;  %vm1020_vm10 = vmpackc.low %vm639_vm7, %vm638_vm6 }
  0x94   :  { %1015 = vmatpush.bf16.xpose.msk.msrb.mxu3 %vm1014_vm4, %v1141_v23  ;;  %vm492_vm4 = vcmp.gt.f32.partialorder %v1368_v37, %v1327_v32  ;;  %vm922_vm8 = vmpackc.low %vm419_vm3, %vm418_vm1  ;;  %vm491_vm1 = vcmp.gt.f32.partialorder %v1368_v37, %v1349_v35  ;;  %vm564_vm3 = vcmp.gt.f32.partialorder %v1376_v38, %v1347_v34  ;;  %v711_v32 = vld [vmem:[#allocation2] sm:$0x3] }
  0x99   :  { %921 = vmatpush.bf16.xpose.msk.msrb.mxu0 %vm920_vm11, %v1141_v23  ;;  %vm954_vm11 = vmpackc.low %vm493_vm5, %vm492_vm4  ;;  %vm565_vm4 = vcmp.gt.f32.partialorder %v1376_v38, %v1349_v35 }
  0x9a   :  { %953 = vmatpush.bf16.xpose.msk.msrb.mxu1 %vm952_vm0, %v1141_v23  ;;  %vm416_vm0 = vcmp.gt.f32.partialorder %v1360_v36, %v1347_v34  ;;  %vm988_vm9 = vmpackc.low %vm565_vm4, %vm564_vm3 }
  0x9b   :  { %985 = vmatpush.bf16.xpose.msk.msrb.mxu2 %vm984_vm2, %v1141_v23  ;;  %vm417_vm2 = vcmp.gt.f32.partialorder %v1360_v36, %v1349_v35  ;;  %v729_v35 = vadd.f32 %v728_v27, %v727_v21 }
  0x9c   :  { %1017 = vmatpush.bf16.xpose.msk.msrb.mxu3 %vm1016_vm14, %v1141_v23  ;;  %vm490_vm14 = vcmp.gt.f32.partialorder %v1368_v37, %v1347_v34  ;;  %vm924_vm5 = vmpackc.low %vm417_vm2, %vm416_vm0  ;;  %v722_v34 = vadd.f32 %v721_v24, %v720_v20  ;;  %v736_v37 = vadd.f32 %v735_v31, %v734_v22 }
  0x9d   :  { %v730_v40 = vrot.slane %v729_v35, 1 }
  0x9e   :  { %v723_v38 = vrot.slane %v722_v34, 1  ;;  %v737_v41 = vrot.slane %v736_v37, 1 }
  0x9f   :  { %v731_v43 = vadd.f32 %v730_v40, %v729_v35 }
  0xa0   :  { %v724_v42 = vadd.f32 %v723_v38, %v722_v34  ;;  %v738_v44 = vadd.f32 %v737_v41, %v736_v37 }
  0xa1   :  { %923 = vmatpush.bf16.xpose.msk.msrb.mxu0 %vm922_vm8, %v1141_v23  ;;  %vm956_vm8 = vmpackc.low %vm491_vm1, %vm490_vm14 }
  0xa2   :  { %955 = vmatpush.bf16.xpose.msk.msrb.mxu1 %vm954_vm11, %v1141_v23  ;;  %vm741_vm11 = vcmask 1042432  }
  0xa3   :  { %987 = vmatpush.bf16.xpose.msk.msrb.mxu2 %vm986_vm12, %v1141_v23  ;;  %vm743_vm12 = vcmask 1043456  }
  0xa4   :  { %1019 = vmatpush.bf16.xpose.msk.msrb.mxu3 %vm1018_vm15, %v1141_v23  ;;  %vm745_vm15 = vcmask 1044480  }
  0xa9   :  { %925 = vmatpush.bf16.xpose.msk.msrb.mxu0 %vm924_vm5, %v1141_v23 }
  0xaa   :  { %957 = vmatpush.bf16.xpose.msk.msrb.mxu1 %vm956_vm8, %v1141_v23 }
  0xab   :  { %989 = vmatpush.bf16.xpose.msk.msrb.mxu2 %vm988_vm9, %v1141_v23 }
  0xac   :  { %1021 = vmatpush.bf16.xpose.msk.msrb.mxu3 %vm1020_vm10, %v1141_v23 }
  0xb0   :  { %483 = vmatmul.bf16.vlgmr.msrb.gmra.mxu0 %v474_v60 }
  0xb1   :  { %557 = vmatmul.bf16.vlgmr.msrb.gmra.mxu1 %v548_v61 }
  0xb2   :  { %631 = vmatmul.bf16.vlgmr.msrb.gmra.mxu2 %v622_v62 }
  0xb3   :  { %705 = vmatmul.bf16.vlgmr.msrb.gmra.mxu3 %v696_v63 }
  0xf2   :  { %v250_v0 = vpop.f32.mrf.mxu0  ;;  %v263_v1 = vpop.f32.mrf.mxu1 }
  0xf3   :  { %v264_v9 = vadd.f32 %v263_v1, %v250_v0 }
  0xf7   :  { %v336_v2 = vpop.f32.mrf.mxu2 }
  0xf8   :  { %v340_v11 = vadd.f32 %v336_v2, %v264_v9 }
  0xf9   :  { %v410_v3 = vpop.f32.mrf.mxu3 }
  0xfa   :  { %v252_v4 = vpop.f32.mrf.mxu0  ;;  %v265_v5 = vpop.f32.mrf.mxu1  ;;  %v414_v15 = vadd.f32 %v410_v3, %v340_v11 }
  0xff   :  { %v338_v6 = vpop.f32.mrf.mxu2 }
 0x101   :  { %v412_v7 = vpop.f32.mrf.mxu3 }
 0x12d   :  { %v484_v13 = vpop.f32.mrf.mxu0 }
 0x12e   :  { %v558_v17 = vpop.f32.mrf.mxu1  ;;  %v488_v19 = vadd.f32 %v484_v13, %v414_v15 }
 0x130   :  { %v562_v23 = vadd.f32 %v558_v17, %v488_v19 }
 0x135   :  { %v632_v25 = vpop.f32.mrf.mxu2  ;;  %v486_v26 = vpop.f32.mrf.mxu0 }
 0x136   :  { %v636_v28 = vadd.f32 %v632_v25, %v562_v23  ;;  %v706_v29 = vpop.f32.mrf.mxu3  ;;  %v560_v30 = vpop.f32.mrf.mxu1 }
 0x138   :  { %v710_v33 = vadd.f32 %v706_v29, %v636_v28 }
 0x13a   :  { %v712_v36 = vadd.f32 %v711_v32, %v710_v33 }
 0x13c   :  { %713 = vst [vmem:[#allocation2] sm:$0x3] %v712_v36 }
 0x13d   :  { %v634_v39 = vpop.f32.mrf.mxu2 }
 0x13e   :  { %v708_v16 = vpop.f32.mrf.mxu3 }
 0x143   :  { %v717_v45 = vld [vmem:[#allocation2] sm:$0x3] }
 0x144   :  { %v740_v46 = vsel %vm739_vm13, %v717_v45, %v724_v42 }
 0x145   :  { %v742_v47 = vsel %vm741_vm11, %v740_v46, %v731_v43 }
 0x146   :  { %v744_v48 = vsel %vm743_vm12, %v742_v47, %v738_v44 }
 0x147   :  { %v746_v49 = vsel %vm745_vm15, %v744_v48, 0.0 }
 0x148   :  { %747 = vst [vmem:[#allocation12] sm:$0xff] %v746_v49 }
 0x149   :  { %758 = dma.vmem_to_hbm [thread:$0]  %s754_s2, 128, %s756_s30, [#allocation8]  }
 0x14a   :  { %1134 = dma.done.wait [#allocation8], 128  }
 0x14b   :  { %1135 = vsyncadd [#allocation8], 4294967168 }
 0x14c   :  { %763 = vsyncpa [#allocation7], 1 }
 0x14d   :  { %764 = vsyncpa [#allocation10], 1 }
 0x14e   :  { %765 = vsyncpa [#allocation8], 1 }

</bundles_post_ra>
